<compile_context>
chip_gen: v6e
topology: v6e:2x2x1
jax: 0.10.0
libtpu: 0.0.40
codegen_flags: <defaults>
</compile_context>

<pallas_src>
import jax
import jax.numpy as jnp
from jax.experimental import pallas as pl
from jax.experimental.pallas import tpu as pltpu


def _symmetry_mlp_kernel(img_ref, txt_ref, w1i_ref, w1t_ref, b1_ref, w2_ref,
                         b2_ref, o_ref):
    # In-kernel VPU cast f32 -> bf16 (free: every vector slot has slack here),
    # keeping the HBM activation stream at 4 B/elem with no extra convert op.
    a_img = img_ref[...].astype(jnp.bfloat16)
    a_txt = txt_ref[...].astype(jnp.bfloat16)

    # fc1: the concat is folded into two bf16 MXU matmuls sharing one f32
    # accumulator:  h = [img, txt] @ [w1_img ; w1_txt] + b1.
    h = jnp.dot(a_img, w1i_ref[...], preferred_element_type=jnp.float32)
    h = h + jnp.dot(a_txt, w1t_ref[...], preferred_element_type=jnp.float32)
    h = jnp.maximum(h + b1_ref[...], 0.0)                 # bias + ReLU (f32, VPU)

    # fc2 has out_features == 1: VPU multiply + lane reduction, MXU stays free.
    y = jnp.sum(h * w2_ref[...], axis=-1, keepdims=True)  # (TB, 1) f32
    y = y + b2_ref[0]                                      # scalar bias from SMEM
    o_ref[...] = jax.nn.sigmoid(y).astype(o_ref.dtype)


def _fit_block_b(block_b, batch, di, dt, hidden):
    """Shrink the batch tile until double-buffered f32 activation tiles plus
    the resident (double-buffered) weights fit a conservative VMEM budget."""
    if batch <= block_b:
        return batch                        # single full-extent block
    tb = block_b
    weight_bytes = (di + dt) * hidden * 2 * 2 + 2 * hidden * 4 * 2  # bf16 w1, f32 b1/w2
    budget = 24 * 1024 * 1024               # leave headroom under 32 MiB scoped default
    while tb > 256:
        act_bytes = 2 * tb * (di + dt) * 4  # double-buffered f32 img+txt tiles
        out_bytes = 2 * tb * 4
        if weight_bytes + act_bytes + out_bytes <= budget:
            break
        tb //= 2
    return tb


def symmetry_classifier_forward(img_features, text_features, params, *,
                                block_b: int = 1024, core_parallel: bool = False):
    """Pallas forward pass of SymmetryClassifier.

    img_features:  (B, Di) f32, text_features: (B, Dt) f32
    params: w1_img (Di, H), w1_txt (Dt, H), b1 (1, H), w2 (1, H), b2 (1,)
    returns: (B, 1) float32 in [0, 1]

    On v7x pass core_parallel=True (and size block_b so the grid has >= ~8
    steps) so both TensorCores stream activation tiles.
    """
    B, Di = img_features.shape
    Bt, Dt = text_features.shape
    assert B == Bt, (B, Bt)
    H = params["b1"].shape[-1]

    # Weights are tiny and reused by every grid step: one-time bf16 cast in the
    # wrapper is fine. Activations stay f32 and are cast inside the kernel.
    w1_img = params["w1_img"].astype(jnp.bfloat16)
    w1_txt = params["w1_txt"].astype(jnp.bfloat16)
    b1 = params["b1"].astype(jnp.float32)
    w2 = params["w2"].astype(jnp.float32)
    b2 = params["b2"].reshape((1,)).astype(jnp.float32)
    img_f32 = img_features.astype(jnp.float32)
    txt_f32 = text_features.astype(jnp.float32)

    tb = _fit_block_b(block_b, B, Di, Dt, H)
    grid = (pl.cdiv(B, tb),)

    grid_spec = pltpu.PrefetchScalarGridSpec(
        num_scalar_prefetch=0,
        grid=grid,
        in_specs=[
            pl.BlockSpec((tb, Di), lambda i: (i, 0)),   # img tile (double-buffered)
            pl.BlockSpec((tb, Dt), lambda i: (i, 0)),   # txt tile (double-buffered)
            pl.BlockSpec((Di, H), lambda i: (0, 0)),    # weights stay VMEM-resident
            pl.BlockSpec((Dt, H), lambda i: (0, 0)),
            pl.BlockSpec((1, H), lambda i: (0, 0)),     # b1
            pl.BlockSpec((1, H), lambda i: (0, 0)),     # w2 (row form)
            pl.BlockSpec(memory_space=pltpu.MemorySpace.SMEM),  # b2 scalar
        ],
        out_specs=pl.BlockSpec((tb, 1), lambda i: (i, 0)),
    )

    # Batch axis semantics: CORE_PARALLEL only changes codegen on multi-TC
    # chips (v7x); the plain string is kept as the safe default elsewhere.
    dim_sem = (pltpu.CORE_PARALLEL,) if core_parallel else ("parallel",)

    flops = 2 * B * (Di + Dt) * H + 2 * B * H
    bytes_accessed = (B * (Di + Dt) * 4        # f32 activations (dominant term)
                      + (Di + Dt) * H * 2      # bf16 fc1 weights
                      + 2 * H * 4 + 4          # b1, w2, b2
                      + B * 4)                 # f32 output

    out = pl.pallas_call(
        _symmetry_mlp_kernel,
        out_shape=jax.ShapeDtypeStruct((B, 1), jnp.float32),
        grid_spec=grid_spec,
        compiler_params=pltpu.CompilerParams(dimension_semantics=dim_sem),
        cost_estimate=pl.CostEstimate(
            flops=flops, transcendentals=B, bytes_accessed=bytes_accessed),
    )(img_f32, txt_f32, w1_img, w1_txt, b1, w2, b2)
    return out


def init_params(key, img_embed_dim, text_embed_dim, hidden_dim):
    """nn.Linear-style uniform fan-in init. fc1.weight is stored transposed
    (in, out) and pre-split into the img / text halves so the kernel never
    needs the concat; fc2.weight is stored as a (1, H) row."""
    d_in = img_embed_dim + text_embed_dim
    k1, k2, k3, k4 = jax.random.split(key, 4)
    bound1 = 1.0 / (d_in ** 0.5)
    bound2 = 1.0 / (hidden_dim ** 0.5)
    w1 = jax.random.uniform(k1, (d_in, hidden_dim), jnp.float32, -bound1, bound1)
    return {
        "w1_img": w1[:img_embed_dim],       # (Di, H)  == fc1.weight[:, :Di].T
        "w1_txt": w1[img_embed_dim:],       # (Dt, H)  == fc1.weight[:, Di:].T
        "b1": jax.random.uniform(k2, (1, hidden_dim), jnp.float32, -bound1, bound1),
        "w2": jax.random.uniform(k3, (1, hidden_dim), jnp.float32, -bound2, bound2),
        "b2": jax.random.uniform(k4, (1,), jnp.float32, -bound2, bound2),
    }


def reference_forward(img_features, text_features, params):
    """Pure-JAX reference (mirrors the kernel's bf16 rounding of MXU operands)."""
    f32 = jnp.float32
    xi = img_features.astype(jnp.bfloat16).astype(f32)
    xt = text_features.astype(jnp.bfloat16).astype(f32)
    w1i = params["w1_img"].astype(jnp.bfloat16).astype(f32)
    w1t = params["w1_txt"].astype(jnp.bfloat16).astype(f32)
    h = jnp.maximum(xi @ w1i + xt @ w1t + params["b1"], 0.0)
    y = jnp.sum(h * params["w2"], axis=-1, keepdims=True) + params["b2"]
    return jax.nn.sigmoid(y)


if __name__ == "__main__":
    # Small shapes consistent with the module (scaled-down embed/hidden dims).
    B = 8
    IMG_DIM = 256
    TEXT_DIM = 128
    HIDDEN = 128

    key = jax.random.PRNGKey(0)
    k_img, k_txt, k_params = jax.random.split(key, 3)

    img_features = jax.random.normal(k_img, (B, IMG_DIM), jnp.float32)
    text_features = jax.random.normal(k_txt, (B, TEXT_DIM), jnp.float32)
    params = init_params(k_params, IMG_DIM, TEXT_DIM, HIDDEN)

    out = symmetry_classifier_forward(img_features, text_features, params)
    out = jax.block_until_ready(out)

    ref = reference_forward(img_features, text_features, params)
    assert out.shape == (B, 1), out.shape
    assert bool(jnp.all(jnp.isfinite(out))), "non-finite output"
    assert jnp.allclose(out, ref, atol=2e-3, rtol=0.0), "mismatch vs reference"

    print("KERNEL_OK")
</pallas_src>

<mosaic_0001>
module attributes {stable_mosaic.version = 11 : i64} {
  func.func @_symmetry_mlp_kernel(%arg0: i32, %arg1: memref<8x256xf32, #tpu.memory_space<vmem>>, %arg2: memref<8x128xf32, #tpu.memory_space<vmem>>, %arg3: memref<256x128xbf16, #tpu.memory_space<vmem>>, %arg4: memref<128x128xbf16, #tpu.memory_space<vmem>>, %arg5: memref<1x128xf32, #tpu.memory_space<vmem>>, %arg6: memref<1x128xf32, #tpu.memory_space<vmem>>, %arg7: memref<1xf32, #tpu.memory_space<smem>>, %arg8: memref<8x1xf32, #tpu.memory_space<vmem>>) attributes {dimension_semantics = [#tpu.dimension_semantics<parallel>], iteration_bounds = array<i64: 1>, scalar_prefetch = 0 : i64, scratch_operands = 0 : i64, tpu.core_type = #tpu.core_type<tc>, window_params = [{transform_indices = @transform_0, window_bounds = array<i64: 8, 256>}, {transform_indices = @transform_1, window_bounds = array<i64: 8, 128>}, {pipeline_mode = #tpu.pipeline_mode<synchronous>, transform_indices = @transform_2, window_bounds = array<i64: 256, 128>}, {pipeline_mode = #tpu.pipeline_mode<synchronous>, transform_indices = @transform_3, window_bounds = array<i64: 128, 128>}, {pipeline_mode = #tpu.pipeline_mode<synchronous>, transform_indices = @transform_4, window_bounds = array<i64: 1, 128>}, {pipeline_mode = #tpu.pipeline_mode<synchronous>, transform_indices = @transform_5, window_bounds = array<i64: 1, 128>}, {transform_indices = @transform_6, window_bounds = array<i64: 1>}, {transform_indices = @transform_7, window_bounds = array<i64: 8, 1>}]} {
    %c0 = arith.constant 0 : index
    %c0_0 = arith.constant 0 : index
    %0 = vector.load %arg1[%c0, %c0_0] : memref<8x256xf32, #tpu.memory_space<vmem>>, vector<8x256xf32>
    %1 = arith.truncf %0 : vector<8x256xf32> to vector<8x256xbf16>
    %c0_1 = arith.constant 0 : index
    %c0_2 = arith.constant 0 : index
    %2 = vector.load %arg2[%c0_1, %c0_2] : memref<8x128xf32, #tpu.memory_space<vmem>>, vector<8x128xf32>
    %3 = arith.truncf %2 : vector<8x128xf32> to vector<8x128xbf16>
    %c0_3 = arith.constant 0 : index
    %c0_4 = arith.constant 0 : index
    %4 = vector.load %arg3[%c0_3, %c0_4] : memref<256x128xbf16, #tpu.memory_space<vmem>>, vector<256x128xbf16>
    %cst = arith.constant dense<0.000000e+00> : vector<8x128xf32>
    %5 = tpu.matmul %1, %4, %cst {dimension_numbers = #tpu.dot_dimension_numbers<[1], [0], [0], [1], [0, 0, 1, 1], [], []>} : vector<8x256xbf16>, vector<256x128xbf16>, vector<8x128xf32> -> vector<8x128xf32>
    %c0_5 = arith.constant 0 : index
    %c0_6 = arith.constant 0 : index
    %6 = vector.load %arg4[%c0_5, %c0_6] : memref<128x128xbf16, #tpu.memory_space<vmem>>, vector<128x128xbf16>
    %cst_7 = arith.constant dense<0.000000e+00> : vector<8x128xf32>
    %7 = tpu.matmul %3, %6, %cst_7 {dimension_numbers = #tpu.dot_dimension_numbers<[1], [0], [0], [1], [0, 0, 1, 1], [], []>} : vector<8x128xbf16>, vector<128x128xbf16>, vector<8x128xf32> -> vector<8x128xf32>
    %8 = arith.addf %5, %7 : vector<8x128xf32>
    %c0_8 = arith.constant 0 : index
    %c0_9 = arith.constant 0 : index
    %9 = vector.load %arg5[%c0_8, %c0_9] : memref<1x128xf32, #tpu.memory_space<vmem>>, vector<1x128xf32>
    %10 = vector.broadcast %9 : vector<1x128xf32> to vector<8x128xf32>
    %11 = arith.addf %8, %10 : vector<8x128xf32>
    %cst_10 = arith.constant 0.000000e+00 : f32
    %12 = vector.broadcast %cst_10 : f32 to vector<8x128xf32>
    %13 = arith.maximumf %11, %12 : vector<8x128xf32>
    %c0_11 = arith.constant 0 : index
    %c0_12 = arith.constant 0 : index
    %14 = vector.load %arg6[%c0_11, %c0_12] : memref<1x128xf32, #tpu.memory_space<vmem>>, vector<1x128xf32>
    %15 = vector.broadcast %14 : vector<1x128xf32> to vector<8x128xf32>
    %16 = arith.mulf %13, %15 : vector<8x128xf32>
    %cst_13 = arith.constant dense<0.000000e+00> : vector<8xf32>
    %17 = vector.multi_reduction <add>, %16, %cst_13 [1] : vector<8x128xf32> to vector<8xf32>
    %18 = vector.shape_cast %17 : vector<8xf32> to vector<8x1xf32>
    %c0_14 = arith.constant 0 : index
    %19 = memref.load %arg7[%c0_14] : memref<1xf32, #tpu.memory_space<smem>>
    %20 = vector.broadcast %19 : f32 to vector<8x1xf32>
    %21 = arith.addf %18, %20 : vector<8x1xf32>
    %22 = arith.negf %21 : vector<8x1xf32>
    %23 = math.exp %22 : vector<8x1xf32>
    %cst_15 = arith.constant 1.000000e+00 : f32
    %24 = vector.broadcast %cst_15 : f32 to vector<8x1xf32>
    %25 = arith.addf %24, %23 : vector<8x1xf32>
    %26 = arith.divf %24, %25 : vector<8x1xf32>
    %c0_16 = arith.constant 0 : index
    %c0_17 = arith.constant 0 : index
    %27 = vector.load %arg8[%c0_16, %c0_17] : memref<8x1xf32, #tpu.memory_space<vmem>>, vector<8x1xf32>
    tpu.vector_store %arg8[%c0_16, %c0_17], %26 {strides = array<i32>} : memref<8x1xf32, #tpu.memory_space<vmem>>, vector<8x1xf32>,
    return
  }
  func.func @transform_0(%arg0: i32) -> (i32, i32) {
    %c0_i32 = arith.constant 0 : i32
    %c0_i32_0 = arith.constant 0 : i32
    return %arg0, %c0_i32 : i32, i32
  }
  func.func @transform_1(%arg0: i32) -> (i32, i32) {
    %c0_i32 = arith.constant 0 : i32
    %c0_i32_0 = arith.constant 0 : i32
    return %arg0, %c0_i32 : i32, i32
  }
  func.func @transform_2(%arg0: i32) -> (i32, i32) {
    %c0_i32 = arith.constant 0 : i32
    %c0_i32_0 = arith.constant 0 : i32
    %c0_i32_1 = arith.constant 0 : i32
    return %c0_i32, %c0_i32_0 : i32, i32
  }
  func.func @transform_3(%arg0: i32) -> (i32, i32) {
    %c0_i32 = arith.constant 0 : i32
    %c0_i32_0 = arith.constant 0 : i32
    %c0_i32_1 = arith.constant 0 : i32
    return %c0_i32, %c0_i32_0 : i32, i32
  }
  func.func @transform_4(%arg0: i32) -> (i32, i32) {
    %c0_i32 = arith.constant 0 : i32
    %c0_i32_0 = arith.constant 0 : i32
    %c0_i32_1 = arith.constant 0 : i32
    return %c0_i32, %c0_i32_0 : i32, i32
  }
  func.func @transform_5(%arg0: i32) -> (i32, i32) {
    %c0_i32 = arith.constant 0 : i32
    %c0_i32_0 = arith.constant 0 : i32
    %c0_i32_1 = arith.constant 0 : i32
    return %c0_i32, %c0_i32_0 : i32, i32
  }
  func.func @transform_6(%arg0: i32) -> i32 {
    %c0_i32 = arith.constant 0 : i32
    %c0_i32_0 = arith.constant 0 : i32
    return %c0_i32 : i32
  }
  func.func @transform_7(%arg0: i32) -> (i32, i32) {
    %c0_i32 = arith.constant 0 : i32
    %c0_i32_0 = arith.constant 0 : i32
    return %arg0, %c0_i32 : i32, i32
  }
}

</mosaic_0001>

<bundles_post_ra>
// kernel: tpu_custom_call.1
= control target key start
LH: loop header
LB: loop body
LE: loop exit
PB: predicated region body
PF: predicated region fallthrough
CT: control target
= control target key end

     0   :  { %13 = vsyncpa [#allocation4], 0  ;;  %s666_s0 = inlined_call_operand.hbm [shape: f32[8,256], index: 0, kind: input, shape index: {}]   ;;  %s667_s1 = inlined_call_operand.hbm [shape: f32[8,128], index: 1, kind: input, shape index: {}]   ;;  %s668_s2 = inlined_call_operand.hbm [shape: bf16[256,128], index: 2, kind: input, shape index: {}]   ;;  %s669_s3 = inlined_call_operand.hbm [shape: bf16[128,128], index: 3, kind: input, shape index: {}]   ;;  %s670_s4 = inlined_call_operand.vmem [shape: f32[1,128], index: 4, kind: input, shape index: {}]   ;;  %s671_s5 = inlined_call_operand.vmem [shape: f32[1,128], index: 5, kind: input, shape index: {}]   ;;  %s672_s6 = inlined_call_operand.<no memory space> [shape: f32[1], index: 6, kind: input, shape index: {}]   ;;  %s673_s7 = inlined_call_operand.vmem [shape: f32[8,1], index: 7, kind: output, shape index: {}]  }
   0x1   :  { %14 = vsyncpa [#allocation6], 0 }
   0x2   :  { %15 = vsyncpa [#allocation9], 0  ;;  %s594_s24 = smov [#allocation5]   ;;  %s595_s26 = smov [#allocation3]  }
   0x3   :  { %s32_s25 = sshll.u32 %s594_s24, 4  ;;  %s22_s27 = sshll.u32 %s595_s26, 4  ;;  %s33_s25 = int_to_ptr.vmem [resolvable:$true] %s32_s25  ;;  %s23_s27 = int_to_ptr.vmem [resolvable:$true] %s22_s27 }
   0x4   :  { %s516_s28 = scalar_lea.vmem %s33_s25, 128  ;;  %p521_p1 = scmp.lt.s32.totalorder %s33_s25, %s33_s25 }
   0x5   :  { %p517_p0 = scmp.ne.s32.totalorder %s33_s25, %s516_s28  ;;  %p522_p2 = scmp.lt.s32.totalorder %s516_s28, %s516_s28 }
   0x7   :  { %p523_p3 = por %p522_p2, %p521_p1 }
   0x9   :  { %p524_p4 = pnand %p523_p3, %p517_p0 }
   0xb   :  { %527 = shalt.err (!%p524_p4)
}
   0xc   :  { %35 = dma.hbm_to_vmem [thread:$0]  %s667_s1, 128, %s33_s25, [#allocation6]  }
   0xd   :  { %s536_s8 = scalar_lea.vmem %s23_s27, 256  ;;  %p541_p6 = scmp.lt.s32.totalorder %s23_s27, %s23_s27 }
   0xe   :  { %p537_p5 = scmp.ne.s32.totalorder %s23_s27, %s536_s8  ;;  %p542_p7 = scmp.lt.s32.totalorder %s536_s8, %s536_s8 }
  0x10   :  { %p543_p8 = por %p542_p7, %p541_p6 }
  0x12   :  { %p544_p9 = pnand %p543_p8, %p537_p5 }
  0x14   :  { %547 = shalt.err (!%p544_p9)
}
  0x15   :  { %25 = dma.hbm_to_vmem [thread:$0]  %s666_s0, 256, %s23_s27, [#allocation4]  }
  0x16   :  { %s596_s11 = smov [#allocation7]  }
  0x17   :  { %s41_s12 = sshll.u32 %s596_s11, 4  ;;  %s42_s12 = int_to_ptr.vmem [resolvable:$true] %s41_s12 }
  0x18   :  { %s556_s13 = scalar_lea.vmem %s42_s12, 2048  ;;  %p561_p11 = scmp.lt.s32.totalorder %s42_s12, %s42_s12 }
  0x19   :  { %p557_p10 = scmp.ne.s32.totalorder %s42_s12, %s556_s13  ;;  %p562_p12 = scmp.lt.s32.totalorder %s556_s13, %s556_s13 }
  0x1b   :  { %p563_p13 = por %p562_p12, %p561_p11 }
  0x1d   :  { %p564_p0 = pnand %p563_p13, %p557_p10 }
  0x1f   :  { %567 = shalt.err (!%p564_p0)
}
  0x20   :  { %s597_s1 = smov 64   ;;  %s598_s14 = smov 4  }
  0x21   :  { %47 = dma.hbm_to_vmem [thread:$0]  %s668_s2, 2048, %s42_s12, [#allocation6], %s597_s1, %s597_s1, %s598_s14  }
  0x22   :  { %s599_s17 = smov [#allocation8]  }
  0x23   :  { %s53_s18 = sshll.u32 %s599_s17, 4  ;;  %s54_s18 = int_to_ptr.vmem [resolvable:$true] %s53_s18 }
  0x24   :  { %s576_s0 = scalar_lea.vmem %s54_s18, 1024  ;;  %p581_p2 = scmp.lt.s32.totalorder %s54_s18, %s54_s18 }
  0x25   :  { %p577_p1 = scmp.ne.s32.totalorder %s54_s18, %s576_s0  ;;  %p582_p3 = scmp.lt.s32.totalorder %s576_s0, %s576_s0 }
  0x27   :  { %p583_p4 = por %p582_p3, %p581_p2 }
  0x29   :  { %p584_p5 = pnand %p583_p4, %p577_p1 }
  0x2b   :  { %587 = shalt.err (!%p584_p5)
}
  0x2c   :  { %59 = dma.hbm_to_vmem [thread:$0]  %s669_s3, 1024, %s54_s18, [#allocation9], %s597_s1, %s597_s1, %s598_s14  }
  0x2d   :  { %588 = dma.done.wait [#allocation4], 256  }
  0x2e   :  { %589 = vsyncadd [#allocation4], 4294967040 }
  0x2f   :  { %590 = dma.done.wait [#allocation6], 2176  }
  0x30   :  { %591 = vsyncadd [#allocation6], 4294965120 }
  0x31   :  { %592 = dma.done.wait [#allocation9], 1024  }
  0x32   :  { %593 = vsyncadd [#allocation9], 4294966272  ;;  %v600_v0 = vmov 0.0   ;;  %vm601_vm0 = vmmov 0   ;;  %v480_v1 = vld [vmem:[#allocation8 + $0x38] sm:$0xff]   ;;  %v483_v4 = vld [vmem:[#allocation8 + $0x30] sm:$0xff]   ;;  %v377_v46 = vstv %s672_s6 }
  0x33   :  { %452 = vmatprep.subr.bf16.mxu0 %v600_v0  ;;  %468 = vmatprep.mubr.msk.bf16.mxu0 %vm601_vm0, %v600_v0  ;;  %v481_v2 = vld [vmem:[#allocation7 + $0x78] sm:$0xff]   ;;  %v484_v5 = vld [vmem:[#allocation7 + $0x70] sm:$0xff]   ;;  %v486_v7 = vld [vmem:[#allocation8 + $0x28] sm:$0xff]   ;;  %vm385_vm1 = vcmask 7168  }
  0x34   :  { %453 = vmatpush3.bf16.msra.mxu0 %v480_v1  ;;  %v482_v3 = vld [vmem:[#allocation7 + $0x38] sm:$0xff]   ;;  %430 = vmatprep.subr.bf16.mxu1 %v481_v2  ;;  %v485_v6 = vld [vmem:[#allocation7 + $0x30] sm:$0xff]   ;;  %v487_v8 = vld [vmem:[#allocation7 + $0x68] sm:$0xff]  }
  0x35   :  { %454 = vmatprep.subr.bf16.mxu0 %v600_v0  ;;  %431 = vmatpush3.bf16.msra.mxu1 %v482_v3  ;;  %v488_v9 = vld [vmem:[#allocation7 + $0x28] sm:$0xff]   ;;  %v489_v10 = vld [vmem:[#allocation8 + $0x20] sm:$0xff]   ;;  %v493_v13 = vld [vmem:[#allocation7 + $0x58] sm:$0xff]  }
  0x36   :  { %432 = vmatprep.subr.bf16.mxu1 %v484_v5  ;;  %v490_v11 = vld [vmem:[#allocation7 + $0x60] sm:$0xff]   ;;  %v492_v14 = vld [vmem:[#allocation8 + $0x18] sm:$0xff]   ;;  %v496_v16 = vld [vmem:[#allocation7 + $0x50] sm:$0xff]  }
  0x37   :  { %v491_v12 = vld [vmem:[#allocation7 + $0x20] sm:$0xff]   ;;  %v494_v15 = vld [vmem:[#allocation7 + $0x18] sm:$0xff]   ;;  %v495_v17 = vld [vmem:[#allocation8 + $0x10] sm:$0xff]  }
  0x38   :  { %455 = vmatpush3.bf16.msra.mxu0 %v483_v4  ;;  %v497_v18 = vld [vmem:[#allocation7 + $0x10] sm:$0xff]   ;;  %v499_v19 = vld [vmem:[#allocation7 + $0x48] sm:$0xff]   ;;  %v502_v23 = vld [vmem:[#allocation7 + $0x40] sm:$0xff]  }
  0x39   :  { %456 = vmatprep.subr.bf16.mxu0 %v600_v0  ;;  %433 = vmatpush3.bf16.msra.mxu1 %v485_v6  ;;  %v498_v20 = vld [vmem:[#allocation8 + $0x8] sm:$0xff]   ;;  %v80_v22 = vld [vmem:[#allocation3 + $0x8] sm:$0xff]  ;;  %v501_v25 = vld [vmem:[#allocation8] sm:$0xff]  }
  0x3a   :  { %434 = vmatprep.subr.bf16.mxu1 %v487_v8  ;;  %v500_v21 = vld [vmem:[#allocation7 + $0x8] sm:$0xff]   ;;  %v82_v24 = vpack.c.bf16 %v80_v22, %v80_v22  ;;  %v83_v26 = vld [vmem:[#allocation5] sm:$0xff]  ;;  %v503_v27 = vld [vmem:[#allocation7] sm:$0xff]  }
  0x3b   :  { %v79_v28 = vld [vmem:[#allocation3] sm:$0xff]  ;;  %v84_v29 = vpack.c.bf16 %v83_v26, %v83_v26 }
  0x3c   :  { %457 = vmatpush3.bf16.msra.mxu0 %v486_v7  ;;  %349 = vmatprep.mubr.bf16.mxu1 %v82_v24  ;;  %v81_v30 = vpack.c.bf16 %v79_v28, %v79_v28  ;;  %v418_v39 = vld [vmem:[%s670_s4] ss:$0 sm:$0xff] }
  0x3d   :  { %458 = vmatprep.subr.bf16.mxu0 %v600_v0  ;;  %435 = vmatpush3.bf16.msra.mxu1 %v488_v9  ;;  %v419_v43 = vld [vmem:[%s671_s5] ss:$0 sm:$0xff] }
  0x3e   :  { %436 = vmatprep.subr.bf16.mxu1 %v490_v11 }
  0x40   :  { %459 = vmatpush3.bf16.msra.mxu0 %v489_v10 }
  0x41   :  { %460 = vmatprep.subr.bf16.mxu0 %v600_v0  ;;  %437 = vmatpush3.bf16.msra.mxu1 %v491_v12 }
  0x42   :  { %438 = vmatprep.subr.bf16.mxu1 %v493_v13 }
  0x44   :  { %461 = vmatpush3.bf16.msra.mxu0 %v492_v14 }
  0x45   :  { %462 = vmatprep.subr.bf16.mxu0 %v600_v0  ;;  %439 = vmatpush3.bf16.msra.mxu1 %v494_v15 }
  0x46   :  { %440 = vmatprep.subr.bf16.mxu1 %v496_v16 }
  0x48   :  { %463 = vmatpush3.bf16.msra.mxu0 %v495_v17 }
  0x49   :  { %464 = vmatprep.subr.bf16.mxu0 %v600_v0  ;;  %441 = vmatpush3.bf16.msra.mxu1 %v497_v18 }
  0x4a   :  { %442 = vmatprep.subr.bf16.mxu1 %v499_v19 }
  0x4c   :  { %465 = vmatpush3.bf16.msra.mxu0 %v498_v20 }
  0x4d   :  { %466 = vmatprep.subr.bf16.mxu0 %v600_v0  ;;  %443 = vmatpush3.bf16.msra.mxu1 %v500_v21 }
  0x4e   :  { %444 = vmatprep.subr.bf16.mxu1 %v502_v23 }
  0x50   :  { %467 = vmatpush3.bf16.msra.mxu0 %v501_v25 }
  0x51   :  { %445 = vmatpush3.bf16.msra.mxu1 %v503_v27 }
  0x53   :  { %469 = vmatmul.mubr.bf16.vlgmr.msra.gmra.mxu0 %v84_v29 }
  0x54   :  { %350 = vmatmul.mubr.bf16.vlgmr.msra.gmra.mxu1 %v81_v30 }
 0x113   :  { %v215_v31 = vpop.f32.mrf.mxu0 }
 0x114   :  { %v446_v32 = vpop.f32.mrf.mxu1 }
 0x115   :  { %v470_v33 = vpop.f32.mrf.mxu0 }
 0x116   :  { %v447_v34 = vpop.f32.mrf.mxu1 }
 0x117   :  { %v218_v35 = vpop.f32.mrf.mxu0  ;;  %v448_v36 = vadd.f32 %v447_v34, %v446_v32 }
 0x118   :  { %v449_v37 = vpop.f32.mrf.mxu1 }
 0x119   :  { %v471_v38 = vpop.f32.mrf.mxu0  ;;  %v352_v40 = vadd.f32 %v448_v36, %v215_v31 }
 0x11a   :  { %v450_v41 = vpop.f32.mrf.mxu1 }
 0x11b   :  { %v364_v42 = vadd.f32 %v418_v39, %v352_v40 }
 0x11d   :  { %v365_v44 = vmax.f32 %v364_v42, 0.0 }
 0x11f   :  { %v373_v45 = vmul.f32 %v419_v43, %v365_v44 }
 0x121   :  { %374 = vadd.xlane.f32.xlu0 %v373_v45 }
 0x1aa   :  { %v375_v47 = vpop.xlane.xlu0 %374 }
 0x1ab   :  { %v378_v48 = vadd.f32 %v377_v46, %v375_v47 }
 0x1ad   :  { %v420_v49 = vmul.f32 -1.442695, %v378_v48 }
 0x1af   :  { %504 = vpow2.f32 %v420_v49 }
 0x1bc   :  { %v505_v50 = vpop.eup %504 }
 0x1bd   :  { %v382_v51 = vadd.f32 1.0, %v505_v50 }
 0x1bf   :  { %506 = vrcp.f32 %v382_v51 }
 0x1cc   :  { %v507_v52 = vpop.eup %506 }
 0x1cd   :  { %386 = vst.msk [vmem:[%s673_s7] sm:$0xff] %vm385_vm1, %v507_v52 }
 0x1ce   :  { %391 = vsyncpa [#allocation4], 1 }
 0x1cf   :  { %392 = vsyncpa [#allocation6], 1 }
 0x1d0   :  { %393 = vsyncpa [#allocation9], 1 }

</bundles_post_ra>
